<compile_context>
chip_gen: v5e
topology: v5e:2x2
jax: 0.10.0
libtpu: 0.0.40
codegen_flags: <defaults>
</compile_context>

<pallas_src>
import jax
import jax.numpy as jnp
from jax import lax
from jax.experimental import pallas as pl
from jax.experimental.pallas import tpu as pltpu


def lstm_head_kernel(xg_ref, whh_ref, wlin_ref, blin_ref, y_ref, h_ref, c_ref):
    """xg_ref:   [Tc, Bb, 4D] bf16  precomputed x@W_ih + (b_ih+b_hh), gates on lanes
       whh_ref:  [D, 4D]      bf16  fused recurrent weight, [D_in, 4*D_out]
       wlin_ref: [D, NCp]     bf16  classifier weight (transposed, lane-padded)
       blin_ref: [1, NCp]     f32   classifier bias (lane-padded)
       y_ref:    [Bb, NCp]    f32   output block (written on the last time block)
       h_ref/c_ref: [Bb, D]   f32   LSTM state, persists across the time grid axis
    """
    t_blk = pl.program_id(1)
    last_blk = pl.num_programs(1) - 1
    t_chunk = xg_ref.shape[0]
    D = h_ref.shape[1]

    @pl.when(t_blk == 0)
    def _init():
        h_ref[...] = jnp.zeros_like(h_ref)
        c_ref[...] = jnp.zeros_like(c_ref)

    def step(t, carry):
        h, c = carry                              # f32, vreg-resident in the chunk
        hb = h.astype(whh_ref.dtype)
        # single fused MXU matmul per step: [Bb, D] @ [D, 4D] -> [Bb, 4D] (f32 acc)
        pre = (xg_ref[t].astype(jnp.float32)
               + jnp.dot(hb, whh_ref[...], preferred_element_type=jnp.float32))
        # one wide sigmoid pass over all 4D lanes; tanh only on the g strip
        sig = jax.nn.sigmoid(pre)
        i_g = sig[:, 0 * D:1 * D]
        f_g = sig[:, 1 * D:2 * D]
        o_g = sig[:, 3 * D:4 * D]
        g_g = jnp.tanh(pre[:, 2 * D:3 * D])
        c_new = f_g * c + i_g * g_g
        h_new = o_g * jnp.tanh(c_new)
        return h_new, c_new

    # bounded unroll keeps the bundle stream sane when t_chunk grows large
    h_fin, c_fin = lax.fori_loop(0, t_chunk, step, (h_ref[...], c_ref[...]),
                                 unroll=min(t_chunk, 8))
    h_ref[...] = h_fin
    c_ref[...] = c_fin

    @pl.when(t_blk == last_blk)
    def _finalize():
        # final Linear on the last cell state c_n (lane-padded to NCp)
        y = (jnp.dot(c_fin.astype(wlin_ref.dtype), wlin_ref[...],
                     preferred_element_type=jnp.float32) + blin_ref[...])
        y_ref[...] = y.astype(y_ref.dtype)


def _round_up(v, m):
    return -(-v // m) * m


def lstm_head_forward(x, w_ih, w_hh, b_ih, b_hh, w_lin, b_lin):
    """x: [B, C, D, T] (PyTorch layout).  Returns y: [B, n_classes] (f32)."""
    B, C, D, T = x.shape
    NC = w_lin.shape[0]
    mm_dtype = jnp.bfloat16

    # ---- XLA-side prep: channel mean + one big fused input-projection GEMM ----
    z = jnp.mean(x.astype(jnp.float32), axis=1)            # [B, D, T]
    z = jnp.transpose(z, (2, 0, 1))                        # [T, B, D]

    # fused gate layout [D_in, 4*D_out], PyTorch gate order (i, f, g, o)
    wih_f = jnp.asarray(w_ih, jnp.float32).T               # [D, 4D]
    whh_f = jnp.asarray(w_hh, jnp.float32).T               # [D, 4D]
    bias = (jnp.asarray(b_ih, jnp.float32)
            + jnp.asarray(b_hh, jnp.float32)).reshape(1, 1, 4 * D)

    # xg[t, b, :] = z[t, b, :] @ W_ih_fused + (b_ih + b_hh)   (no recurrent dep)
    xg = jnp.einsum("tbd,dh->tbh",
                    z.astype(mm_dtype), wih_f.astype(mm_dtype),
                    preferred_element_type=jnp.float32) + bias   # [T, B, 4D] f32
    # stream in bf16: halves HBM traffic + VMEM double-buffer footprint
    xg = xg.astype(mm_dtype)

    # pad batch to a multiple of 8 sublanes -> lane/sublane-dense xg blocks
    B_pad = max(8, _round_up(B, 8))
    if B_pad != B:
        xg = jnp.pad(xg, ((0, 0), (0, B_pad - B), (0, 0)))

    # lane-dense classifier: zero-pad n_classes to a multiple of 128 lanes
    NC_pad = max(128, _round_up(NC, 128))
    wlin_k = (jnp.zeros((D, NC_pad), jnp.float32)
              .at[:, :NC].set(jnp.asarray(w_lin, jnp.float32).T)).astype(mm_dtype)
    blin_k = (jnp.zeros((1, NC_pad), jnp.float32)
              .at[:, :NC].set(jnp.asarray(b_lin, jnp.float32)))
    whh_k = whh_f.astype(mm_dtype)                          # [D, 4D] bf16

    # ---- chip-aware knobs ------------------------------------------------------
    # scoped VMEM: explicit limit (v7x only has 64 MiB physical VMEM)
    try:
        vmem_cap = int(pltpu.get_tpu_info().vmem_capacity_bytes)
    except Exception:
        vmem_cap = 64 * 1024 * 1024
    vmem_limit = int(min(vmem_cap // 2, 64 * 1024 * 1024))

    # batch split only pays on 2-TensorCore chips (v7x); v5e/v6e are single-TC
    try:
        n_tc = 2 if "v7" in jax.devices()[0].device_kind.lower() else 1
    except Exception:
        n_tc = 1
    bb = B_pad // 2 if (n_tc == 2 and B_pad % 16 == 0) else B_pad
    nb = B_pad // bb

    # time chunk sized so the double-buffered xg block uses <= ~25% of VMEM limit
    step_bytes = bb * 4 * D * 2                             # one bf16 time step
    budget = vmem_limit // 4
    t_max = max(1, min(T, budget // (2 * step_bytes), 256))
    t_chunk = 1
    for c in range(int(t_max), 0, -1):
        if T % c == 0:
            t_chunk = c
            break
    nt = T // t_chunk

    # NOTE: time MUST be the last (minor) grid axis and marked "arbitrary";
    # h/c scratch is carried across time blocks and reset under pl.when(t==0).
    grid_spec = pltpu.PrefetchScalarGridSpec(
        num_scalar_prefetch=0,
        grid=(nb, nt),
        in_specs=[
            pl.BlockSpec((t_chunk, bb, 4 * D), lambda b, t: (t, b, 0)),  # xg
            pl.BlockSpec((D, 4 * D),           lambda b, t: (0, 0)),     # W_hh
            pl.BlockSpec((D, NC_pad),          lambda b, t: (0, 0)),     # W_lin
            pl.BlockSpec((1, NC_pad),          lambda b, t: (0, 0)),     # b_lin
        ],
        out_specs=pl.BlockSpec((bb, NC_pad), lambda b, t: (b, 0)),
        scratch_shapes=[pltpu.VMEM((bb, D), jnp.float32),   # h
                        pltpu.VMEM((bb, D), jnp.float32)],  # c
    )

    y = pl.pallas_call(
        lstm_head_kernel,
        out_shape=jax.ShapeDtypeStruct((B_pad, NC_pad), jnp.float32),
        grid_spec=grid_spec,
        compiler_params=pltpu.CompilerParams(
            dimension_semantics=("parallel", "arbitrary"),
            vmem_limit_bytes=vmem_limit),
    )(xg, whh_k, wlin_k, blin_k)

    return y[:B, :NC]


def reference_forward(x, w_ih, w_hh, b_ih, b_hh, w_lin, b_lin):
    """Pure-JAX f32 reference mirroring the PyTorch module."""
    z = jnp.mean(x, axis=1)                 # [B, D, T]
    z = jnp.transpose(z, (0, 2, 1))         # [B, T, D]
    B, T, D = z.shape
    h = jnp.zeros((B, D), jnp.float32)
    c = jnp.zeros((B, D), jnp.float32)
    for t in range(T):
        g = z[:, t, :] @ w_ih.T + b_ih + h @ w_hh.T + b_hh
        i = jax.nn.sigmoid(g[:, :D])
        f = jax.nn.sigmoid(g[:, D:2 * D])
        gg = jnp.tanh(g[:, 2 * D:3 * D])
        o = jax.nn.sigmoid(g[:, 3 * D:])
        c = f * c + i * gg
        h = o * jnp.tanh(c)
    return c @ w_lin.T + b_lin              # Linear on final cell state c_n


if __name__ == "__main__":
    # small shapes consistent with the module
    B, C, D, T = 2, 4, 32, 8          # bs, nvars, d_model, num_patch
    NC = 5                            # n_classes

    key = jax.random.PRNGKey(0)
    kx, k1, k2, k3, k4, k5, k6 = jax.random.split(key, 7)

    x = jax.random.normal(kx, (B, C, D, T), jnp.float32)

    # PyTorch-style uniform(-1/sqrt(D), 1/sqrt(D)) init, gate order i,f,g,o
    s = 1.0 / jnp.sqrt(jnp.float32(D))
    w_ih = jax.random.uniform(k1, (4 * D, D), jnp.float32, -s, s)
    w_hh = jax.random.uniform(k2, (4 * D, D), jnp.float32, -s, s)
    b_ih = jax.random.uniform(k3, (4 * D,), jnp.float32, -s, s)
    b_hh = jax.random.uniform(k4, (4 * D,), jnp.float32, -s, s)
    w_lin = jax.random.uniform(k5, (NC, D), jnp.float32, -s, s)
    b_lin = jax.random.uniform(k6, (NC,), jnp.float32, -s, s)

    y = jax.block_until_ready(
        lstm_head_forward(x, w_ih, w_hh, b_ih, b_hh, w_lin, b_lin))

    y_ref = reference_forward(x, w_ih, w_hh, b_ih, b_hh, w_lin, b_lin)
    assert y.shape == (B, NC)
    # bf16 streamed activations + bf16 recurrent operands (f32 accumulation)
    # vs a pure-f32 reference => modest tolerance
    assert jnp.allclose(y, y_ref, atol=5e-2, rtol=5e-2), (y, y_ref)

    print("KERNEL_OK")
</pallas_src>

<mosaic_0001>
module attributes {stable_mosaic.version = 11 : i64} {
  func.func @lstm_head_kernel(%arg0: i32, %arg1: i32, %arg2: memref<8x8x128xbf16, #tpu.memory_space<vmem>>, %arg3: memref<32x128xbf16, #tpu.memory_space<vmem>>, %arg4: memref<32x128xbf16, #tpu.memory_space<vmem>>, %arg5: memref<1x128xf32, #tpu.memory_space<vmem>>, %arg6: memref<8x128xf32, #tpu.memory_space<vmem>>, %arg7: memref<8x32xf32, #tpu.memory_space<vmem>>, %arg8: memref<8x32xf32, #tpu.memory_space<vmem>>) attributes {dimension_semantics = [#tpu.dimension_semantics<parallel>, #tpu.dimension_semantics<arbitrary>], iteration_bounds = array<i64: 1, 1>, scalar_prefetch = 0 : i64, scratch_operands = 2 : i64, tpu.core_type = #tpu.core_type<tc>, window_params = [{transform_indices = @transform_0, window_bounds = array<i64: 8, 8, 128>}, {pipeline_mode = #tpu.pipeline_mode<synchronous>, transform_indices = @transform_1, window_bounds = array<i64: 32, 128>}, {pipeline_mode = #tpu.pipeline_mode<synchronous>, transform_indices = @transform_2, window_bounds = array<i64: 32, 128>}, {pipeline_mode = #tpu.pipeline_mode<synchronous>, transform_indices = @transform_3, window_bounds = array<i64: 1, 128>}, {transform_indices = @transform_4, window_bounds = array<i64: 8, 128>}]} {
    %c0_i32 = arith.constant 0 : i32
    %0 = arith.cmpi eq, %arg1, %c0_i32 : i32
    %1 = arith.extui %0 : i1 to i32
    %c0_i32_0 = arith.constant 0 : i32
    %2 = arith.cmpi ne, %1, %c0_i32_0 : i32
    scf.if %2 {
      %cst_58 = arith.constant 0.000000e+00 : f32
      %194 = vector.broadcast %cst_58 : f32 to vector<8x32xf32>
      %c0_59 = arith.constant 0 : index
      %c0_60 = arith.constant 0 : index
      %195 = vector.load %arg7[%c0_59, %c0_60] : memref<8x32xf32, #tpu.memory_space<vmem>>, vector<8x32xf32>
      tpu.vector_store %arg7[%c0_59, %c0_60], %194 {strides = array<i32>} : memref<8x32xf32, #tpu.memory_space<vmem>>, vector<8x32xf32>,
      %cst_61 = arith.constant 0.000000e+00 : f32
      %196 = vector.broadcast %cst_61 : f32 to vector<8x32xf32>
      %c0_62 = arith.constant 0 : index
      %c0_63 = arith.constant 0 : index
      %197 = vector.load %arg8[%c0_62, %c0_63] : memref<8x32xf32, #tpu.memory_space<vmem>>, vector<8x32xf32>
      tpu.vector_store %arg8[%c0_62, %c0_63], %196 {strides = array<i32>} : memref<8x32xf32, #tpu.memory_space<vmem>>, vector<8x32xf32>,
    } else {
    }
    %c0 = arith.constant 0 : index
    %c0_1 = arith.constant 0 : index
    %3 = vector.load %arg7[%c0, %c0_1] : memref<8x32xf32, #tpu.memory_space<vmem>>, vector<8x32xf32>
    %c0_2 = arith.constant 0 : index
    %c0_3 = arith.constant 0 : index
    %4 = vector.load %arg8[%c0_2, %c0_3] : memref<8x32xf32, #tpu.memory_space<vmem>>, vector<8x32xf32>
    %c0_i32_4 = arith.constant 0 : i32
    %5 = arith.truncf %3 : vector<8x32xf32> to vector<8x32xbf16>
    %6 = arith.index_cast %c0_i32_4 : i32 to index
    %c0_5 = arith.constant 0 : index
    %c0_6 = arith.constant 0 : index
    %7 = vector.load %arg2[%6, %c0_5, %c0_6] : memref<8x8x128xbf16, #tpu.memory_space<vmem>>, vector<1x8x128xbf16>
    %8 = vector.shape_cast %7 : vector<1x8x128xbf16> to vector<8x128xbf16>
    %9 = arith.extf %8 : vector<8x128xbf16> to vector<8x128xf32>
    %c0_7 = arith.constant 0 : index
    %c0_8 = arith.constant 0 : index
    %10 = vector.load %arg3[%c0_7, %c0_8] : memref<32x128xbf16, #tpu.memory_space<vmem>>, vector<32x128xbf16>
    %cst = arith.constant dense<0.000000e+00> : vector<8x128xf32>
    %11 = tpu.matmul %5, %10, %cst {dimension_numbers = #tpu.dot_dimension_numbers<[1], [0], [0], [1], [0, 0, 1, 1], [], []>} : vector<8x32xbf16>, vector<32x128xbf16>, vector<8x128xf32> -> vector<8x128xf32>
    %12 = arith.addf %9, %11 : vector<8x128xf32>
    %13 = arith.negf %12 : vector<8x128xf32>
    %14 = math.exp %13 : vector<8x128xf32>
    %cst_9 = arith.constant 1.000000e+00 : f32
    %15 = vector.broadcast %cst_9 : f32 to vector<8x128xf32>
    %16 = arith.addf %15, %14 : vector<8x128xf32>
    %17 = arith.divf %15, %16 : vector<8x128xf32>
    %18 = vector.extract_strided_slice %17 {offsets = [0, 0], sizes = [8, 32], strides = [1, 1]} : vector<8x128xf32> to vector<8x32xf32>
    %19 = vector.extract_strided_slice %17 {offsets = [0, 32], sizes = [8, 32], strides = [1, 1]} : vector<8x128xf32> to vector<8x32xf32>
    %20 = vector.extract_strided_slice %17 {offsets = [0, 96], sizes = [8, 32], strides = [1, 1]} : vector<8x128xf32> to vector<8x32xf32>
    %21 = vector.extract_strided_slice %12 {offsets = [0, 64], sizes = [8, 32], strides = [1, 1]} : vector<8x128xf32> to vector<8x32xf32>
    %22 = math.tanh %21 : vector<8x32xf32>
    %23 = arith.mulf %19, %4 : vector<8x32xf32>
    %24 = arith.mulf %18, %22 : vector<8x32xf32>
    %25 = arith.addf %23, %24 : vector<8x32xf32>
    %26 = math.tanh %25 : vector<8x32xf32>
    %27 = arith.mulf %20, %26 : vector<8x32xf32>
    %c1_i32 = arith.constant 1 : i32
    %28 = arith.truncf %27 : vector<8x32xf32> to vector<8x32xbf16>
    %29 = arith.index_cast %c1_i32 : i32 to index
    %c0_10 = arith.constant 0 : index
    %c0_11 = arith.constant 0 : index
    %30 = vector.load %arg2[%29, %c0_10, %c0_11] : memref<8x8x128xbf16, #tpu.memory_space<vmem>>, vector<1x8x128xbf16>
    %31 = vector.shape_cast %30 : vector<1x8x128xbf16> to vector<8x128xbf16>
    %32 = arith.extf %31 : vector<8x128xbf16> to vector<8x128xf32>
    %c0_12 = arith.constant 0 : index
    %c0_13 = arith.constant 0 : index
    %33 = vector.load %arg3[%c0_12, %c0_13] : memref<32x128xbf16, #tpu.memory_space<vmem>>, vector<32x128xbf16>
    %cst_14 = arith.constant dense<0.000000e+00> : vector<8x128xf32>
    %34 = tpu.matmul %28, %33, %cst_14 {dimension_numbers = #tpu.dot_dimension_numbers<[1], [0], [0], [1], [0, 0, 1, 1], [], []>} : vector<8x32xbf16>, vector<32x128xbf16>, vector<8x128xf32> -> vector<8x128xf32>
    %35 = arith.addf %32, %34 : vector<8x128xf32>
    %36 = arith.negf %35 : vector<8x128xf32>
    %37 = math.exp %36 : vector<8x128xf32>
    %cst_15 = arith.constant 1.000000e+00 : f32
    %38 = vector.broadcast %cst_15 : f32 to vector<8x128xf32>
    %39 = arith.addf %38, %37 : vector<8x128xf32>
    %40 = arith.divf %38, %39 : vector<8x128xf32>
    %41 = vector.extract_strided_slice %40 {offsets = [0, 0], sizes = [8, 32], strides = [1, 1]} : vector<8x128xf32> to vector<8x32xf32>
    %42 = vector.extract_strided_slice %40 {offsets = [0, 32], sizes = [8, 32], strides = [1, 1]} : vector<8x128xf32> to vector<8x32xf32>
    %43 = vector.extract_strided_slice %40 {offsets = [0, 96], sizes = [8, 32], strides = [1, 1]} : vector<8x128xf32> to vector<8x32xf32>
    %44 = vector.extract_strided_slice %35 {offsets = [0, 64], sizes = [8, 32], strides = [1, 1]} : vector<8x128xf32> to vector<8x32xf32>
    %45 = math.tanh %44 : vector<8x32xf32>
    %46 = arith.mulf %42, %25 : vector<8x32xf32>
    %47 = arith.mulf %41, %45 : vector<8x32xf32>
    %48 = arith.addf %46, %47 : vector<8x32xf32>
    %49 = math.tanh %48 : vector<8x32xf32>
    %50 = arith.mulf %43, %49 : vector<8x32xf32>
    %c2_i32 = arith.constant 2 : i32
    %51 = arith.truncf %50 : vector<8x32xf32> to vector<8x32xbf16>
    %52 = arith.index_cast %c2_i32 : i32 to index
    %c0_16 = arith.constant 0 : index
    %c0_17 = arith.constant 0 : index
    %53 = vector.load %arg2[%52, %c0_16, %c0_17] : memref<8x8x128xbf16, #tpu.memory_space<vmem>>, vector<1x8x128xbf16>
    %54 = vector.shape_cast %53 : vector<1x8x128xbf16> to vector<8x128xbf16>
    %55 = arith.extf %54 : vector<8x128xbf16> to vector<8x128xf32>
    %c0_18 = arith.constant 0 : index
    %c0_19 = arith.constant 0 : index
    %56 = vector.load %arg3[%c0_18, %c0_19] : memref<32x128xbf16, #tpu.memory_space<vmem>>, vector<32x128xbf16>
    %cst_20 = arith.constant dense<0.000000e+00> : vector<8x128xf32>
    %57 = tpu.matmul %51, %56, %cst_20 {dimension_numbers = #tpu.dot_dimension_numbers<[1], [0], [0], [1], [0, 0, 1, 1], [], []>} : vector<8x32xbf16>, vector<32x128xbf16>, vector<8x128xf32> -> vector<8x128xf32>
    %58 = arith.addf %55, %57 : vector<8x128xf32>
    %59 = arith.negf %58 : vector<8x128xf32>
    %60 = math.exp %59 : vector<8x128xf32>
    %cst_21 = arith.constant 1.000000e+00 : f32
    %61 = vector.broadcast %cst_21 : f32 to vector<8x128xf32>
    %62 = arith.addf %61, %60 : vector<8x128xf32>
    %63 = arith.divf %61, %62 : vector<8x128xf32>
    %64 = vector.extract_strided_slice %63 {offsets = [0, 0], sizes = [8, 32], strides = [1, 1]} : vector<8x128xf32> to vector<8x32xf32>
    %65 = vector.extract_strided_slice %63 {offsets = [0, 32], sizes = [8, 32], strides = [1, 1]} : vector<8x128xf32> to vector<8x32xf32>
    %66 = vector.extract_strided_slice %63 {offsets = [0, 96], sizes = [8, 32], strides = [1, 1]} : vector<8x128xf32> to vector<8x32xf32>
    %67 = vector.extract_strided_slice %58 {offsets = [0, 64], sizes = [8, 32], strides = [1, 1]} : vector<8x128xf32> to vector<8x32xf32>
    %68 = math.tanh %67 : vector<8x32xf32>
    %69 = arith.mulf %65, %48 : vector<8x32xf32>
    %70 = arith.mulf %64, %68 : vector<8x32xf32>
    %71 = arith.addf %69, %70 : vector<8x32xf32>
    %72 = math.tanh %71 : vector<8x32xf32>
    %73 = arith.mulf %66, %72 : vector<8x32xf32>
    %c3_i32 = arith.constant 3 : i32
    %74 = arith.truncf %73 : vector<8x32xf32> to vector<8x32xbf16>
    %75 = arith.index_cast %c3_i32 : i32 to index
    %c0_22 = arith.constant 0 : index
    %c0_23 = arith.constant 0 : index
    %76 = vector.load %arg2[%75, %c0_22, %c0_23] : memref<8x8x128xbf16, #tpu.memory_space<vmem>>, vector<1x8x128xbf16>
    %77 = vector.shape_cast %76 : vector<1x8x128xbf16> to vector<8x128xbf16>
    %78 = arith.extf %77 : vector<8x128xbf16> to vector<8x128xf32>
    %c0_24 = arith.constant 0 : index
    %c0_25 = arith.constant 0 : index
    %79 = vector.load %arg3[%c0_24, %c0_25] : memref<32x128xbf16, #tpu.memory_space<vmem>>, vector<32x128xbf16>
    %cst_26 = arith.constant dense<0.000000e+00> : vector<8x128xf32>
    %80 = tpu.matmul %74, %79, %cst_26 {dimension_numbers = #tpu.dot_dimension_numbers<[1], [0], [0], [1], [0, 0, 1, 1], [], []>} : vector<8x32xbf16>, vector<32x128xbf16>, vector<8x128xf32> -> vector<8x128xf32>
    %81 = arith.addf %78, %80 : vector<8x128xf32>
    %82 = arith.negf %81 : vector<8x128xf32>
    %83 = math.exp %82 : vector<8x128xf32>
    %cst_27 = arith.constant 1.000000e+00 : f32
    %84 = vector.broadcast %cst_27 : f32 to vector<8x128xf32>
    %85 = arith.addf %84, %83 : vector<8x128xf32>
    %86 = arith.divf %84, %85 : vector<8x128xf32>
    %87 = vector.extract_strided_slice %86 {offsets = [0, 0], sizes = [8, 32], strides = [1, 1]} : vector<8x128xf32> to vector<8x32xf32>
    %88 = vector.extract_strided_slice %86 {offsets = [0, 32], sizes = [8, 32], strides = [1, 1]} : vector<8x128xf32> to vector<8x32xf32>
    %89 = vector.extract_strided_slice %86 {offsets = [0, 96], sizes = [8, 32], strides = [1, 1]} : vector<8x128xf32> to vector<8x32xf32>
    %90 = vector.extract_strided_slice %81 {offsets = [0, 64], sizes = [8, 32], strides = [1, 1]} : vector<8x128xf32> to vector<8x32xf32>
    %91 = math.tanh %90 : vector<8x32xf32>
    %92 = arith.mulf %88, %71 : vector<8x32xf32>
    %93 = arith.mulf %87, %91 : vector<8x32xf32>
    %94 = arith.addf %92, %93 : vector<8x32xf32>
    %95 = math.tanh %94 : vector<8x32xf32>
    %96 = arith.mulf %89, %95 : vector<8x32xf32>
    %c4_i32 = arith.constant 4 : i32
    %97 = arith.truncf %96 : vector<8x32xf32> to vector<8x32xbf16>
    %98 = arith.index_cast %c4_i32 : i32 to index
    %c0_28 = arith.constant 0 : index
    %c0_29 = arith.constant 0 : index
    %99 = vector.load %arg2[%98, %c0_28, %c0_29] : memref<8x8x128xbf16, #tpu.memory_space<vmem>>, vector<1x8x128xbf16>
    %100 = vector.shape_cast %99 : vector<1x8x128xbf16> to vector<8x128xbf16>
    %101 = arith.extf %100 : vector<8x128xbf16> to vector<8x128xf32>
    %c0_30 = arith.constant 0 : index
    %c0_31 = arith.constant 0 : index
    %102 = vector.load %arg3[%c0_30, %c0_31] : memref<32x128xbf16, #tpu.memory_space<vmem>>, vector<32x128xbf16>
    %cst_32 = arith.constant dense<0.000000e+00> : vector<8x128xf32>
    %103 = tpu.matmul %97, %102, %cst_32 {dimension_numbers = #tpu.dot_dimension_numbers<[1], [0], [0], [1], [0, 0, 1, 1], [], []>} : vector<8x32xbf16>, vector<32x128xbf16>, vector<8x128xf32> -> vector<8x128xf32>
    %104 = arith.addf %101, %103 : vector<8x128xf32>
    %105 = arith.negf %104 : vector<8x128xf32>
    %106 = math.exp %105 : vector<8x128xf32>
    %cst_33 = arith.constant 1.000000e+00 : f32
    %107 = vector.broadcast %cst_33 : f32 to vector<8x128xf32>
    %108 = arith.addf %107, %106 : vector<8x128xf32>
    %109 = arith.divf %107, %108 : vector<8x128xf32>
    %110 = vector.extract_strided_slice %109 {offsets = [0, 0], sizes = [8, 32], strides = [1, 1]} : vector<8x128xf32> to vector<8x32xf32>
    %111 = vector.extract_strided_slice %109 {offsets = [0, 32], sizes = [8, 32], strides = [1, 1]} : vector<8x128xf32> to vector<8x32xf32>
    %112 = vector.extract_strided_slice %109 {offsets = [0, 96], sizes = [8, 32], strides = [1, 1]} : vector<8x128xf32> to vector<8x32xf32>
    %113 = vector.extract_strided_slice %104 {offsets = [0, 64], sizes = [8, 32], strides = [1, 1]} : vector<8x128xf32> to vector<8x32xf32>
    %114 = math.tanh %113 : vector<8x32xf32>
    %115 = arith.mulf %111, %94 : vector<8x32xf32>
    %116 = arith.mulf %110, %114 : vector<8x32xf32>
    %117 = arith.addf %115, %116 : vector<8x32xf32>
    %118 = math.tanh %117 : vector<8x32xf32>
    %119 = arith.mulf %112, %118 : vector<8x32xf32>
    %c5_i32 = arith.constant 5 : i32
    %120 = arith.truncf %119 : vector<8x32xf32> to vector<8x32xbf16>
    %121 = arith.index_cast %c5_i32 : i32 to index
    %c0_34 = arith.constant 0 : index
    %c0_35 = arith.constant 0 : index
    %122 = vector.load %arg2[%121, %c0_34, %c0_35] : memref<8x8x128xbf16, #tpu.memory_space<vmem>>, vector<1x8x128xbf16>
    %123 = vector.shape_cast %122 : vector<1x8x128xbf16> to vector<8x128xbf16>
    %124 = arith.extf %123 : vector<8x128xbf16> to vector<8x128xf32>
    %c0_36 = arith.constant 0 : index
    %c0_37 = arith.constant 0 : index
    %125 = vector.load %arg3[%c0_36, %c0_37] : memref<32x128xbf16, #tpu.memory_space<vmem>>, vector<32x128xbf16>
    %cst_38 = arith.constant dense<0.000000e+00> : vector<8x128xf32>
    %126 = tpu.matmul %120, %125, %cst_38 {dimension_numbers = #tpu.dot_dimension_numbers<[1], [0], [0], [1], [0, 0, 1, 1], [], []>} : vector<8x32xbf16>, vector<32x128xbf16>, vector<8x128xf32> -> vector<8x128xf32>
    %127 = arith.addf %124, %126 : vector<8x128xf32>
    %128 = arith.negf %127 : vector<8x128xf32>
    %129 = math.exp %128 : vector<8x128xf32>
    %cst_39 = arith.constant 1.000000e+00 : f32
    %130 = vector.broadcast %cst_39 : f32 to vector<8x128xf32>
    %131 = arith.addf %130, %129 : vector<8x128xf32>
    %132 = arith.divf %130, %131 : vector<8x128xf32>
    %133 = vector.extract_strided_slice %132 {offsets = [0, 0], sizes = [8, 32], strides = [1, 1]} : vector<8x128xf32> to vector<8x32xf32>
    %134 = vector.extract_strided_slice %132 {offsets = [0, 32], sizes = [8, 32], strides = [1, 1]} : vector<8x128xf32> to vector<8x32xf32>
    %135 = vector.extract_strided_slice %132 {offsets = [0, 96], sizes = [8, 32], strides = [1, 1]} : vector<8x128xf32> to vector<8x32xf32>
    %136 = vector.extract_strided_slice %127 {offsets = [0, 64], sizes = [8, 32], strides = [1, 1]} : vector<8x128xf32> to vector<8x32xf32>
    %137 = math.tanh %136 : vector<8x32xf32>
    %138 = arith.mulf %134, %117 : vector<8x32xf32>
    %139 = arith.mulf %133, %137 : vector<8x32xf32>
    %140 = arith.addf %138, %139 : vector<8x32xf32>
    %141 = math.tanh %140 : vector<8x32xf32>
    %142 = arith.mulf %135, %141 : vector<8x32xf32>
    %c6_i32 = arith.constant 6 : i32
    %143 = arith.truncf %142 : vector<8x32xf32> to vector<8x32xbf16>
    %144 = arith.index_cast %c6_i32 : i32 to index
    %c0_40 = arith.constant 0 : index
    %c0_41 = arith.constant 0 : index
    %145 = vector.load %arg2[%144, %c0_40, %c0_41] : memref<8x8x128xbf16, #tpu.memory_space<vmem>>, vector<1x8x128xbf16>
    %146 = vector.shape_cast %145 : vector<1x8x128xbf16> to vector<8x128xbf16>
    %147 = arith.extf %146 : vector<8x128xbf16> to vector<8x128xf32>
    %c0_42 = arith.constant 0 : index
    %c0_43 = arith.constant 0 : index
    %148 = vector.load %arg3[%c0_42, %c0_43] : memref<32x128xbf16, #tpu.memory_space<vmem>>, vector<32x128xbf16>
    %cst_44 = arith.constant dense<0.000000e+00> : vector<8x128xf32>
    %149 = tpu.matmul %143, %148, %cst_44 {dimension_numbers = #tpu.dot_dimension_numbers<[1], [0], [0], [1], [0, 0, 1, 1], [], []>} : vector<8x32xbf16>, vector<32x128xbf16>, vector<8x128xf32> -> vector<8x128xf32>
    %150 = arith.addf %147, %149 : vector<8x128xf32>
    %151 = arith.negf %150 : vector<8x128xf32>
    %152 = math.exp %151 : vector<8x128xf32>
    %cst_45 = arith.constant 1.000000e+00 : f32
    %153 = vector.broadcast %cst_45 : f32 to vector<8x128xf32>
    %154 = arith.addf %153, %152 : vector<8x128xf32>
    %155 = arith.divf %153, %154 : vector<8x128xf32>
    %156 = vector.extract_strided_slice %155 {offsets = [0, 0], sizes = [8, 32], strides = [1, 1]} : vector<8x128xf32> to vector<8x32xf32>
    %157 = vector.extract_strided_slice %155 {offsets = [0, 32], sizes = [8, 32], strides = [1, 1]} : vector<8x128xf32> to vector<8x32xf32>
    %158 = vector.extract_strided_slice %155 {offsets = [0, 96], sizes = [8, 32], strides = [1, 1]} : vector<8x128xf32> to vector<8x32xf32>
    %159 = vector.extract_strided_slice %150 {offsets = [0, 64], sizes = [8, 32], strides = [1, 1]} : vector<8x128xf32> to vector<8x32xf32>
    %160 = math.tanh %159 : vector<8x32xf32>
    %161 = arith.mulf %157, %140 : vector<8x32xf32>
    %162 = arith.mulf %156, %160 : vector<8x32xf32>
    %163 = arith.addf %161, %162 : vector<8x32xf32>
    %164 = math.tanh %163 : vector<8x32xf32>
    %165 = arith.mulf %158, %164 : vector<8x32xf32>
    %c7_i32 = arith.constant 7 : i32
    %166 = arith.truncf %165 : vector<8x32xf32> to vector<8x32xbf16>
    %167 = arith.index_cast %c7_i32 : i32 to index
    %c0_46 = arith.constant 0 : index
    %c0_47 = arith.constant 0 : index
    %168 = vector.load %arg2[%167, %c0_46, %c0_47] : memref<8x8x128xbf16, #tpu.memory_space<vmem>>, vector<1x8x128xbf16>
    %169 = vector.shape_cast %168 : vector<1x8x128xbf16> to vector<8x128xbf16>
    %170 = arith.extf %169 : vector<8x128xbf16> to vector<8x128xf32>
    %c0_48 = arith.constant 0 : index
    %c0_49 = arith.constant 0 : index
    %171 = vector.load %arg3[%c0_48, %c0_49] : memref<32x128xbf16, #tpu.memory_space<vmem>>, vector<32x128xbf16>
    %cst_50 = arith.constant dense<0.000000e+00> : vector<8x128xf32>
    %172 = tpu.matmul %166, %171, %cst_50 {dimension_numbers = #tpu.dot_dimension_numbers<[1], [0], [0], [1], [0, 0, 1, 1], [], []>} : vector<8x32xbf16>, vector<32x128xbf16>, vector<8x128xf32> -> vector<8x128xf32>
    %173 = arith.addf %170, %172 : vector<8x128xf32>
    %174 = arith.negf %173 : vector<8x128xf32>
    %175 = math.exp %174 : vector<8x128xf32>
    %cst_51 = arith.constant 1.000000e+00 : f32
    %176 = vector.broadcast %cst_51 : f32 to vector<8x128xf32>
    %177 = arith.addf %176, %175 : vector<8x128xf32>
    %178 = arith.divf %176, %177 : vector<8x128xf32>
    %179 = vector.extract_strided_slice %178 {offsets = [0, 0], sizes = [8, 32], strides = [1, 1]} : vector<8x128xf32> to vector<8x32xf32>
    %180 = vector.extract_strided_slice %178 {offsets = [0, 32], sizes = [8, 32], strides = [1, 1]} : vector<8x128xf32> to vector<8x32xf32>
    %181 = vector.extract_strided_slice %178 {offsets = [0, 96], sizes = [8, 32], strides = [1, 1]} : vector<8x128xf32> to vector<8x32xf32>
    %182 = vector.extract_strided_slice %173 {offsets = [0, 64], sizes = [8, 32], strides = [1, 1]} : vector<8x128xf32> to vector<8x32xf32>
    %183 = math.tanh %182 : vector<8x32xf32>
    %184 = arith.mulf %180, %163 : vector<8x32xf32>
    %185 = arith.mulf %179, %183 : vector<8x32xf32>
    %186 = arith.addf %184, %185 : vector<8x32xf32>
    %187 = math.tanh %186 : vector<8x32xf32>
    %188 = arith.mulf %181, %187 : vector<8x32xf32>
    %c8_i32 = arith.constant 8 : i32
    %c0_52 = arith.constant 0 : index
    %c0_53 = arith.constant 0 : index
    %189 = vector.load %arg7[%c0_52, %c0_53] : memref<8x32xf32, #tpu.memory_space<vmem>>, vector<8x32xf32>
    tpu.vector_store %arg7[%c0_52, %c0_53], %188 {strides = array<i32>} : memref<8x32xf32, #tpu.memory_space<vmem>>, vector<8x32xf32>,
    %c0_54 = arith.constant 0 : index
    %c0_55 = arith.constant 0 : index
    %190 = vector.load %arg8[%c0_54, %c0_55] : memref<8x32xf32, #tpu.memory_space<vmem>>, vector<8x32xf32>
    tpu.vector_store %arg8[%c0_54, %c0_55], %186 {strides = array<i32>} : memref<8x32xf32, #tpu.memory_space<vmem>>, vector<8x32xf32>,
    %c0_i32_56 = arith.constant 0 : i32
    %191 = arith.cmpi eq, %arg1, %c0_i32_56 : i32
    %192 = arith.extui %191 : i1 to i32
    %c0_i32_57 = arith.constant 0 : i32
    %193 = arith.cmpi ne, %192, %c0_i32_57 : i32
    scf.if %193 {
      %194 = arith.truncf %186 : vector<8x32xf32> to vector<8x32xbf16>
      %c0_58 = arith.constant 0 : index
      %c0_59 = arith.constant 0 : index
      %195 = vector.load %arg4[%c0_58, %c0_59] : memref<32x128xbf16, #tpu.memory_space<vmem>>, vector<32x128xbf16>
      %cst_60 = arith.constant dense<0.000000e+00> : vector<8x128xf32>
      %196 = tpu.matmul %194, %195, %cst_60 {dimension_numbers = #tpu.dot_dimension_numbers<[1], [0], [0], [1], [0, 0, 1, 1], [], []>} : vector<8x32xbf16>, vector<32x128xbf16>, vector<8x128xf32> -> vector<8x128xf32>
      %c0_61 = arith.constant 0 : index
      %c0_62 = arith.constant 0 : index
      %197 = vector.load %arg5[%c0_61, %c0_62] : memref<1x128xf32, #tpu.memory_space<vmem>>, vector<1x128xf32>
      %198 = vector.broadcast %197 : vector<1x128xf32> to vector<8x128xf32>
      %199 = arith.addf %196, %198 : vector<8x128xf32>
      %c0_63 = arith.constant 0 : index
      %c0_64 = arith.constant 0 : index
      %200 = vector.load %arg6[%c0_63, %c0_64] : memref<8x128xf32, #tpu.memory_space<vmem>>, vector<8x128xf32>
      tpu.vector_store %arg6[%c0_63, %c0_64], %199 {strides = array<i32>} : memref<8x128xf32, #tpu.memory_space<vmem>>, vector<8x128xf32>,
    } else {
    }
    return
  }
  func.func @transform_0(%arg0: i32, %arg1: i32) -> (i32, i32, i32) {
    %c0_i32 = arith.constant 0 : i32
    %c0_i32_0 = arith.constant 0 : i32
    return %arg1, %arg0, %c0_i32 : i32, i32, i32
  }
  func.func @transform_1(%arg0: i32, %arg1: i32) -> (i32, i32) {
    %c0_i32 = arith.constant 0 : i32
    %c0_i32_0 = arith.constant 0 : i32
    %c0_i32_1 = arith.constant 0 : i32
    return %c0_i32, %c0_i32_0 : i32, i32
  }
  func.func @transform_2(%arg0: i32, %arg1: i32) -> (i32, i32) {
    %c0_i32 = arith.constant 0 : i32
    %c0_i32_0 = arith.constant 0 : i32
    %c0_i32_1 = arith.constant 0 : i32
    return %c0_i32, %c0_i32_0 : i32, i32
  }
  func.func @transform_3(%arg0: i32, %arg1: i32) -> (i32, i32) {
    %c0_i32 = arith.constant 0 : i32
    %c0_i32_0 = arith.constant 0 : i32
    %c0_i32_1 = arith.constant 0 : i32
    return %c0_i32, %c0_i32_0 : i32, i32
  }
  func.func @transform_4(%arg0: i32, %arg1: i32) -> (i32, i32) {
    %c0_i32 = arith.constant 0 : i32
    %c0_i32_0 = arith.constant 0 : i32
    return %arg0, %c0_i32 : i32, i32
  }
}

</mosaic_0001>

<bundles_post_ra>
// kernel: tpu_custom_call.1
= control target key start
LH: loop header
LB: loop body
LE: loop exit
PB: predicated region body
PF: predicated region fallthrough
CT: control target
= control target key end

     0   :  { %9 = vsyncpa [#allocation5], 0  ;;  %s966_s0 = inlined_call_operand.hbm [shape: bf16[8,8,128], index: 0, kind: input, shape index: {}]   ;;  %s967_s1 = inlined_call_operand.hbm [shape: bf16[32,128], index: 1, kind: input, shape index: {}]   ;;  %s968_s2 = inlined_call_operand.hbm [shape: bf16[32,128], index: 2, kind: input, shape index: {}]   ;;  %s969_s3 = inlined_call_operand.vmem [shape: f32[1,128], index: 3, kind: input, shape index: {}]   ;;  %s970_s4 = inlined_call_operand.hbm [shape: f32[8,128], index: 4, kind: output, shape index: {}]  }
   0x1   :  { %10 = vsyncpa [#allocation8], 0 }
   0x2   :  { %11 = vsyncpa [#allocation6], 0  ;;  %s29_s17 = sshll.u32 %s967_s1, 4  ;;  %s865_s18 = smov [#allocation7]   ;;  %s30_s17 = int_to_ptr.hbm [resolvable:$true] %s29_s17 }
   0x3   :  { %s31_s19 = sshll.u32 %s865_s18, 4  ;;  %s16_s22 = sshll.u32 %s966_s0, 4  ;;  %s32_s19 = int_to_ptr.vmem [resolvable:$true] %s31_s19  ;;  %s17_s22 = int_to_ptr.hbm [resolvable:$true] %s16_s22 }
   0x4   :  { %s866_s23 = smov 64   ;;  %s867_s24 = smov 4  }
   0x5   :  { %37 = dma.hbm_to_vmem [thread:$0]  %s30_s17, 256, %s32_s19, [#allocation8], %s866_s23, %s866_s23, %s867_s24  }
   0x6   :  { %s868_s25 = smov [#allocation4]   ;;  %s42_s1 = sshll.u32 %s968_s2, 4  ;;  %s43_s1 = int_to_ptr.hbm [resolvable:$true] %s42_s1 }
   0x7   :  { %s18_s26 = sshll.u32 %s868_s25, 4  ;;  %s869_s29 = smov [#allocation9]   ;;  %s19_s26 = int_to_ptr.vmem [resolvable:$true] %s18_s26 }
   0x8   :  { %24 = dma.hbm_to_vmem [thread:$0]  %s17_s22, 512, %s19_s26, [#allocation5], %s866_s23, %s866_s23, %s867_s24  }
   0x9   :  { %s44_s30 = sshll.u32 %s869_s29, 4  ;;  %s45_s30 = int_to_ptr.vmem [resolvable:$true] %s44_s30 }
   0xa   :  { %50 = dma.hbm_to_vmem [thread:$0]  %s43_s1, 256, %s45_s30, [#allocation8], %s866_s23, %s866_s23, %s867_s24  }
   0xb   :  { %859 = dma.done.wait [#allocation5], 512  }
   0xc   :  { %860 = vsyncadd [#allocation5], 4294966784 }
   0xd   :  { %861 = dma.done.wait [#allocation8], 512  }
   0xe   :  { %862 = vsyncadd [#allocation8], 4294966784  ;;  %vm70_vm0 = vcmask 261120   ;;  %v870_v0 = vmov 0.0   ;;  %v686_v1 = vld [vmem:[#allocation7 + $0x8] sm:$0xff]  ;;  %v685_v2 = vld [vmem:[#allocation7] sm:$0xff] }
   0xf   :  { %71 = vst.msk [vmem:[#allocation2] sm:$0xff] %vm70_vm0, %v870_v0  ;;  %104 = vmatpush.bf16.msra.mxu0 %v686_v1  ;;  %169 = vmatpush.bf16.msra.mxu1 %v686_v1  ;;  %v76_v5 = vld [vmem:[#allocation4] sm:$0xff]   ;;  %s871_s0 = smov 32   ;;  %s872_s2 = smov 96  }
  0x10   :  { %72 = vst.msk [vmem:[#allocation3] sm:$0xff] %vm70_vm0, %v870_v0  ;;  %230 = vmatpush.bf16.msra.mxu2 %v686_v1  ;;  %291 = vmatpush.bf16.msra.mxu3 %v686_v1  ;;  %v77_v6 = vunpack.c.l.bf16 %v76_v5  ;;  %v156_v36 = vunpack.c.h.bf16 %v76_v5  ;;  %v216_v0 = vld [vmem:[#allocation4 + $0x8] sm:$0xff]   ;;  %s873_s7 = smov [#allocation10]   ;;  %s641_s11 = sshll.u32 %s970_s4, 4  ;;  %s642_s11 = int_to_ptr.hbm [resolvable:$true] %s641_s11 }
  0x11   :  { %s639_s8 = sshll.u32 %s873_s7, 4  ;;  %s640_s8 = int_to_ptr.vmem [resolvable:$true] %s639_s8 }
  0x13   :  { %105 = vmatpush.bf16.msra.mxu0 %v685_v2  ;;  %170 = vmatpush.bf16.msra.mxu1 %v685_v2 }
  0x14   :  { %231 = vmatpush.bf16.msra.mxu2 %v685_v2  ;;  %292 = vmatpush.bf16.msra.mxu3 %v685_v2 }
  0x16   :  { %v73_v3 = vld [vmem:[#allocation2] sm:$0xff] }
  0x17   :  { %v75_v4 = vpack.c.bf16 %v73_v3, %v73_v3  ;;  %352 = vmatpush.bf16.msrb.mxu0 %v686_v1  ;;  %413 = vmatpush.bf16.msrb.mxu1 %v686_v1  ;;  %v74_v11 = vld [vmem:[#allocation3] sm:$0xff] }
  0x18   :  { %474 = vmatpush.bf16.msrb.mxu2 %v686_v1  ;;  %535 = vmatpush.bf16.msrb.mxu3 %v686_v1  ;;  %v217_v1 = vunpack.c.l.bf16 %v216_v0 }
  0x19   :  { %660 = vmatmul.msk.bf16.vlgmr.msra.gmra.mxu0 %vm70_vm0, %v75_v4 }
  0x1b   :  { %353 = vmatpush.bf16.msrb.mxu0 %v685_v2  ;;  %414 = vmatpush.bf16.msrb.mxu1 %v685_v2 }
  0x1c   :  { %475 = vmatpush.bf16.msrb.mxu2 %v685_v2  ;;  %536 = vmatpush.bf16.msrb.mxu3 %v685_v2 }
  0x96   :  { %v107_v7 = vpop.f32.mrf.mxu0 }
  0x97   :  { %v111_v8 = vadd.f32 %v107_v7, %v77_v6 }
  0x99   :  { %699 = vtanh.f32 %v111_v8  ;;  %v661_v12 = vmul.f32 -1.442695, %v111_v8 }
  0x9b   :  { %701 = vpow2.f32 %v661_v12 }
  0x9e   :  { %v109_v9 = vpop.f32.mrf.mxu0 }
  0x9f   :  { %v700_v10 = vpop.eup %699 }
  0xa0   :  { %138 = vrot.lane.b32.xlu0 %v700_v10, %s866_s23 }
  0xa1   :  { %v702_v13 = vpop.eup %701 }
  0xa2   :  { %v115_v14 = vadd.f32 1.0, %v702_v13 }
  0xa4   :  { %703 = vrcp.f32 %v115_v14  ;;  %v127_v20 = vand.u32 2147483648, %v115_v14  ;;  %vm121_vm2 = vweird.f32 %v115_v14  ;;  %v125_v21 = vand.u32 2147483647, %v115_v14 }
  0xa6   :  { %v128_v23 = vor.u32 1.1754944e-38, %v127_v20  ;;  %vm126_vm4 = vcmp.eq.f32.partialorder %v125_v21, 8.507059e+37 }
  0xa8   :  { %133 = vrot.lane.b32.xlu0 %v74_v11, %s871_s0 }
  0xaa   :  { %v704_v15 = vpop.eup %703 }
  0xab   :  { %v117_v16 = vmul.f32 %v704_v15, %v115_v14  ;;  %vm122_vm1 = vweird.f32 %v704_v15 }
  0xac   :  { %vm123_vm3 = vmor %vm121_vm2, %vm122_vm1 }
  0xad   :  { %v118_v17 = vsub.f32 1.0, %v117_v16 }
  0xaf   :  { %v119_v18 = vmul.f32 %v704_v15, %v118_v17 }
  0xb1   :  { %v120_v19 = vadd.f32 %v704_v15, %v119_v18 }
  0xb3   :  { %v124_v22 = vsel %vm123_vm3, %v704_v15, %v120_v19 }
  0xb4   :  { %v129_v25 = vsel %vm126_vm4, %v128_v23, %v124_v22 }
 0x112   :  { %v139_v24 = vpop.permute.xlu0 %138 }
 0x113   :  { %v141_v26 = vmul.f32 %v139_v24, %v129_v25 }
 0x115   :  { %143 = vrot.lane.b32.xlu1 %v141_v26, %s871_s0 }
 0x11a   :  { %v134_v27 = vpop.permute.xlu0 %133 }
 0x11b   :  { %v136_v28 = vmul.f32 %v134_v27, %v129_v25 }
 0x187   :  { %v144_v29 = vpop.permute.xlu1 %143 }
 0x188   :  { %v146_v30 = vadd.f32 %v144_v29, %v136_v28  ;;  %v278_v29 = vunpack.c.h.bf16 %v216_v0 }
 0x18a   :  { %705 = vtanh.f32 %v146_v30 }
 0x190   :  { %v706_v31 = vpop.eup %705 }
 0x191   :  { %149 = vrot.lane.b32.xlu1 %v706_v31, %s866_s23 }
 0x203   :  { %v150_v32 = vpop.permute.xlu1 %149 }
 0x204   :  { %v152_v33 = vmul.f32 %v150_v32, %v129_v25 }
 0x206   :  { %v153_v34 = vpack.c.bf16 %v152_v33, %v152_v33 }
 0x208   :  { %158 = vrot.lane.b32.xlu2 %v153_v34, %s871_s0 }
 0x262   :  { %v159_v35 = vpop.permute.xlu2 %158 }
 0x263   :  { %662 = vmatmul.msk.bf16.vlgmr.msra.gmra.mxu1 %vm70_vm0, %v159_v35 }
 0x2e0   :  { %v172_v37 = vpop.f32.mrf.mxu1 }
 0x2e1   :  { %v176_v38 = vadd.f32 %v172_v37, %v156_v36 }
 0x2e3   :  { %707 = vtanh.f32 %v176_v38  ;;  %v663_v41 = vmul.f32 -1.442695, %v176_v38 }
 0x2e5   :  { %709 = vpow2.f32 %v663_v41 }
 0x2e8   :  { %v174_v39 = vpop.f32.mrf.mxu1 }
 0x2e9   :  { %v708_v40 = vpop.eup %707 }
 0x2ea   :  { %199 = vrot.lane.b32.xlu2 %v708_v40, %s866_s23 }
 0x2eb   :  { %v710_v42 = vpop.eup %709 }
 0x2ec   :  { %v180_v43 = vadd.f32 1.0, %v710_v42 }
 0x2ee   :  { %711 = vrcp.f32 %v180_v43  ;;  %v192_v49 = vand.u32 2147483648, %v180_v43  ;;  %vm186_vm6 = vweird.f32 %v180_v43  ;;  %v190_v50 = vand.u32 2147483647, %v180_v43 }
 0x2f0   :  { %v193_v52 = vor.u32 1.1754944e-38, %v192_v49  ;;  %vm191_vm8 = vcmp.eq.f32.partialorder %v190_v50, 8.507059e+37 }
 0x2f4   :  { %v712_v44 = vpop.eup %711 }
 0x2f5   :  { %v182_v45 = vmul.f32 %v712_v44, %v180_v43  ;;  %vm187_vm5 = vweird.f32 %v712_v44 }
 0x2f6   :  { %vm188_vm7 = vmor %vm186_vm6, %vm187_vm5 }
 0x2f7   :  { %v183_v46 = vsub.f32 1.0, %v182_v45 }
 0x2f9   :  { %v184_v47 = vmul.f32 %v712_v44, %v183_v46 }
 0x2fb   :  { %v185_v48 = vadd.f32 %v712_v44, %v184_v47 }
 0x2fd   :  { %v189_v51 = vsel %vm188_vm7, %v712_v44, %v185_v48 }
 0x2fe   :  { %v194_v54 = vsel %vm191_vm8, %v193_v52, %v189_v51 }
 0x2ff   :  { %v197_v56 = vmul.f32 %v194_v54, %v146_v30 }
 0x344   :  { %v200_v53 = vpop.permute.xlu2 %199 }
 0x345   :  { %v202_v55 = vmul.f32 %v200_v53, %v194_v54 }
 0x347   :  { %204 = vrot.lane.b32.xlu0 %v202_v55, %s871_s0 }
 0x3b9   :  { %v205_v57 = vpop.permute.xlu0 %204 }
 0x3ba   :  { %v207_v58 = vadd.f32 %v205_v57, %v197_v56  ;;  %v338_v57 = vld [vmem:[#allocation4 + $0x10] sm:$0xff]  }
 0x3bc   :  { %713 = vtanh.f32 %v207_v58 }
 0x3c2   :  { %v714_v59 = vpop.eup %713 }
 0x3c3   :  { %210 = vrot.lane.b32.xlu1 %v714_v59, %s866_s23 }
 0x435   :  { %v211_v60 = vpop.permute.xlu1 %210 }
 0x436   :  { %v213_v61 = vmul.f32 %v211_v60, %v194_v54 }
 0x438   :  { %v214_v62 = vpack.c.bf16 %v213_v61, %v213_v61 }
 0x43a   :  { %219 = vrot.lane.b32.xlu2 %v214_v62, %s871_s0 }
 0x494   :  { %v220_v63 = vpop.permute.xlu2 %219 }
 0x495   :  { %664 = vmatmul.msk.bf16.vlgmr.msra.gmra.mxu2 %vm70_vm0, %v220_v63 }
 0x518   :  { %v233_v2 = vpop.f32.mrf.mxu2 }
 0x519   :  { %v237_v3 = vadd.f32 %v233_v2, %v217_v1 }
 0x51b   :  { %715 = vtanh.f32 %v237_v3  ;;  %v665_v6 = vmul.f32 -1.442695, %v237_v3 }
 0x51d   :  { %717 = vpow2.f32 %v665_v6 }
 0x520   :  { %v235_v4 = vpop.f32.mrf.mxu2 }
 0x521   :  { %v716_v5 = vpop.eup %715 }
 0x522   :  { %260 = vrot.lane.b32.xlu0 %v716_v5, %s866_s23 }
 0x523   :  { %v718_v7 = vpop.eup %717 }
 0x524   :  { %v241_v8 = vadd.f32 1.0, %v718_v7 }
 0x526   :  { %719 = vrcp.f32 %v241_v8  ;;  %v253_v14 = vand.u32 2147483648, %v241_v8  ;;  %vm247_vm10 = vweird.f32 %v241_v8  ;;  %v251_v15 = vand.u32 2147483647, %v241_v8 }
 0x528   :  { %v254_v17 = vor.u32 1.1754944e-38, %v253_v14  ;;  %vm252_vm12 = vcmp.eq.f32.partialorder %v251_v15, 8.507059e+37 }
 0x52c   :  { %v720_v9 = vpop.eup %719 }
 0x52d   :  { %v243_v10 = vmul.f32 %v720_v9, %v241_v8  ;;  %vm248_vm9 = vweird.f32 %v720_v9 }
 0x52e   :  { %vm249_vm11 = vmor %vm247_vm10, %vm248_vm9 }
 0x52f   :  { %v244_v11 = vsub.f32 1.0, %v243_v10 }
 0x531   :  { %v245_v12 = vmul.f32 %v720_v9, %v244_v11 }
 0x533   :  { %v246_v13 = vadd.f32 %v720_v9, %v245_v12 }
 0x535   :  { %v250_v16 = vsel %vm249_vm11, %v720_v9, %v246_v13 }
 0x536   :  { %v255_v19 = vsel %vm252_vm12, %v254_v17, %v250_v16 }
 0x537   :  { %v258_v21 = vmul.f32 %v255_v19, %v207_v58  ;;  %v339_v58 = vunpack.c.l.bf16 %v338_v57 }
 0x594   :  { %v261_v18 = vpop.permute.xlu0 %260 }
 0x595   :  { %v263_v20 = vmul.f32 %v261_v18, %v255_v19 }
 0x597   :  { %265 = vrot.lane.b32.xlu1 %v263_v20, %s871_s0 }
 0x609   :  { %v266_v22 = vpop.permute.xlu1 %265 }
 0x60a   :  { %v268_v23 = vadd.f32 %v266_v22, %v258_v21  ;;  %v400_v22 = vunpack.c.h.bf16 %v338_v57 }
 0x60c   :  { %721 = vtanh.f32 %v268_v23 }
 0x612   :  { %v722_v24 = vpop.eup %721 }
 0x613   :  { %271 = vrot.lane.b32.xlu2 %v722_v24, %s866_s23 }
 0x66d   :  { %v272_v25 = vpop.permute.xlu2 %271 }
 0x66e   :  { %v274_v26 = vmul.f32 %v272_v25, %v255_v19 }
 0x670   :  { %v275_v27 = vpack.c.bf16 %v274_v26, %v274_v26 }
 0x672   :  { %280 = vrot.lane.b32.xlu0 %v275_v27, %s871_s0 }
 0x6e4   :  { %v281_v28 = vpop.permute.xlu0 %280 }
 0x6e5   :  { %666 = vmatmul.msk.bf16.vlgmr.msra.gmra.mxu3 %vm70_vm0, %v281_v28 }
 0x768   :  { %v294_v30 = vpop.f32.mrf.mxu3 }
 0x769   :  { %v298_v31 = vadd.f32 %v294_v30, %v278_v29 }
 0x76b   :  { %723 = vtanh.f32 %v298_v31  ;;  %v667_v34 = vmul.f32 -1.442695, %v298_v31 }
 0x76d   :  { %725 = vpow2.f32 %v667_v34 }
 0x770   :  { %v296_v32 = vpop.f32.mrf.mxu3 }
 0x771   :  { %v724_v33 = vpop.eup %723 }
 0x772   :  { %321 = vrot.lane.b32.xlu1 %v724_v33, %s866_s23 }
 0x773   :  { %v726_v35 = vpop.eup %725 }
 0x774   :  { %v302_v36 = vadd.f32 1.0, %v726_v35 }
 0x776   :  { %727 = vrcp.f32 %v302_v36  ;;  %v314_v42 = vand.u32 2147483648, %v302_v36  ;;  %vm308_vm14 = vweird.f32 %v302_v36  ;;  %v312_v43 = vand.u32 2147483647, %v302_v36 }
 0x778   :  { %v315_v45 = vor.u32 1.1754944e-38, %v314_v42  ;;  %vm313_vm1 = vcmp.eq.f32.partialorder %v312_v43, 8.507059e+37 }
 0x77c   :  { %v728_v37 = vpop.eup %727 }
 0x77d   :  { %v304_v38 = vmul.f32 %v728_v37, %v302_v36  ;;  %vm309_vm13 = vweird.f32 %v728_v37 }
 0x77e   :  { %vm310_vm15 = vmor %vm308_vm14, %vm309_vm13 }
 0x77f   :  { %v305_v39 = vsub.f32 1.0, %v304_v38 }
 0x781   :  { %v306_v40 = vmul.f32 %v728_v37, %v305_v39 }
 0x783   :  { %v307_v41 = vadd.f32 %v728_v37, %v306_v40 }
 0x785   :  { %v311_v44 = vsel %vm310_vm15, %v728_v37, %v307_v41 }
 0x786   :  { %v316_v47 = vsel %vm313_vm1, %v315_v45, %v311_v44 }
 0x787   :  { %v319_v49 = vmul.f32 %v316_v47, %v268_v23 }
 0x7e4   :  { %v322_v46 = vpop.permute.xlu1 %321 }
 0x7e5   :  { %v324_v48 = vmul.f32 %v322_v46, %v316_v47 }
 0x7e7   :  { %326 = vrot.lane.b32.xlu2 %v324_v48, %s871_s0 }
 0x841   :  { %v327_v50 = vpop.permute.xlu2 %326 }
 0x842   :  { %v329_v51 = vadd.f32 %v327_v50, %v319_v49  ;;  %v460_v50 = vld [vmem:[#allocation4 + $0x18] sm:$0xff]  }
 0x844   :  { %729 = vtanh.f32 %v329_v51 }
 0x84a   :  { %v730_v52 = vpop.eup %729 }
 0x84b   :  { %332 = vrot.lane.b32.xlu0 %v730_v52, %s866_s23 }
 0x8bd   :  { %v333_v53 = vpop.permute.xlu0 %332 }
 0x8be   :  { %v335_v54 = vmul.f32 %v333_v53, %v316_v47 }
 0x8c0   :  { %v336_v55 = vpack.c.bf16 %v335_v54, %v335_v54 }
 0x8c2   :  { %341 = vrot.lane.b32.xlu1 %v336_v55, %s871_s0 }
 0x934   :  { %v342_v56 = vpop.permute.xlu1 %341 }
 0x935   :  { %668 = vmatmul.msk.bf16.vlgmr.msrb.gmra.mxu0 %vm70_vm0, %v342_v56 }
 0x9b2   :  { %v355_v59 = vpop.f32.mrf.mxu0 }
 0x9b3   :  { %v359_v60 = vadd.f32 %v355_v59, %v339_v58 }
 0x9b5   :  { %731 = vtanh.f32 %v359_v60  ;;  %v669_v63 = vmul.f32 -1.442695, %v359_v60 }
 0x9b7   :  { %733 = vpow2.f32 %v669_v63 }
 0x9ba   :  { %v357_v61 = vpop.f32.mrf.mxu0 }
 0x9bb   :  { %v732_v62 = vpop.eup %731 }
 0x9bc   :  { %382 = vrot.lane.b32.xlu2 %v732_v62, %s866_s23 }
 0x9bd   :  { %v734_v0 = vpop.eup %733 }
 0x9be   :  { %v363_v1 = vadd.f32 1.0, %v734_v0 }
 0x9c0   :  { %735 = vrcp.f32 %v363_v1  ;;  %v375_v7 = vand.u32 2147483648, %v363_v1  ;;  %vm369_vm3 = vweird.f32 %v363_v1  ;;  %v373_v8 = vand.u32 2147483647, %v363_v1 }
 0x9c2   :  { %v376_v10 = vor.u32 1.1754944e-38, %v375_v7  ;;  %vm374_vm5 = vcmp.eq.f32.partialorder %v373_v8, 8.507059e+37 }
 0x9c6   :  { %v736_v2 = vpop.eup %735 }
 0x9c7   :  { %v365_v3 = vmul.f32 %v736_v2, %v363_v1  ;;  %vm370_vm2 = vweird.f32 %v736_v2 }
 0x9c8   :  { %vm371_vm4 = vmor %vm369_vm3, %vm370_vm2 }
 0x9c9   :  { %v366_v4 = vsub.f32 1.0, %v365_v3 }
 0x9cb   :  { %v367_v5 = vmul.f32 %v736_v2, %v366_v4 }
 0x9cd   :  { %v368_v6 = vadd.f32 %v736_v2, %v367_v5 }
 0x9cf   :  { %v372_v9 = vsel %vm371_vm4, %v736_v2, %v368_v6 }
 0x9d0   :  { %v377_v12 = vsel %vm374_vm5, %v376_v10, %v372_v9 }
 0x9d1   :  { %v380_v14 = vmul.f32 %v377_v12, %v329_v51  ;;  %v461_v51 = vunpack.c.l.bf16 %v460_v50 }
 0xa16   :  { %v383_v11 = vpop.permute.xlu2 %382 }
 0xa17   :  { %v385_v13 = vmul.f32 %v383_v11, %v377_v12 }
 0xa19   :  { %387 = vrot.lane.b32.xlu0 %v385_v13, %s871_s0 }
 0xa8b   :  { %v388_v15 = vpop.permute.xlu0 %387 }
 0xa8c   :  { %v390_v16 = vadd.f32 %v388_v15, %v380_v14  ;;  %v522_v15 = vunpack.c.h.bf16 %v460_v50 }
 0xa8e   :  { %737 = vtanh.f32 %v390_v16 }
 0xa94   :  { %v738_v17 = vpop.eup %737 }
 0xa95   :  { %393 = vrot.lane.b32.xlu1 %v738_v17, %s866_s23 }
 0xb07   :  { %v394_v18 = vpop.permute.xlu1 %393 }
 0xb08   :  { %v396_v19 = vmul.f32 %v394_v18, %v377_v12 }
 0xb0a   :  { %v397_v20 = vpack.c.bf16 %v396_v19, %v396_v19 }
 0xb0c   :  { %402 = vrot.lane.b32.xlu2 %v397_v20, %s871_s0 }
 0xb66   :  { %v403_v21 = vpop.permute.xlu2 %402 }
 0xb67   :  { %670 = vmatmul.msk.bf16.vlgmr.msrb.gmra.mxu1 %vm70_vm0, %v403_v21 }
 0xbe4   :  { %v416_v23 = vpop.f32.mrf.mxu1 }
 0xbe5   :  { %v420_v24 = vadd.f32 %v416_v23, %v400_v22 }
 0xbe7   :  { %739 = vtanh.f32 %v420_v24  ;;  %v671_v27 = vmul.f32 -1.442695, %v420_v24 }
 0xbe9   :  { %741 = vpow2.f32 %v671_v27 }
 0xbec   :  { %v418_v25 = vpop.f32.mrf.mxu1 }
 0xbed   :  { %v740_v26 = vpop.eup %739 }
 0xbee   :  { %443 = vrot.lane.b32.xlu0 %v740_v26, %s866_s23 }
 0xbef   :  { %v742_v28 = vpop.eup %741 }
 0xbf0   :  { %v424_v29 = vadd.f32 1.0, %v742_v28 }
 0xbf2   :  { %743 = vrcp.f32 %v424_v29  ;;  %v436_v35 = vand.u32 2147483648, %v424_v29  ;;  %vm430_vm7 = vweird.f32 %v424_v29  ;;  %v434_v36 = vand.u32 2147483647, %v424_v29 }
 0xbf4   :  { %v437_v38 = vor.u32 1.1754944e-38, %v436_v35  ;;  %vm435_vm9 = vcmp.eq.f32.partialorder %v434_v36, 8.507059e+37 }
 0xbf8   :  { %v744_v30 = vpop.eup %743 }
 0xbf9   :  { %v426_v31 = vmul.f32 %v744_v30, %v424_v29  ;;  %vm431_vm6 = vweird.f32 %v744_v30 }
 0xbfa   :  { %vm432_vm8 = vmor %vm430_vm7, %vm431_vm6 }
 0xbfb   :  { %v427_v32 = vsub.f32 1.0, %v426_v31 }
 0xbfd   :  { %v428_v33 = vmul.f32 %v744_v30, %v427_v32 }
 0xbff   :  { %v429_v34 = vadd.f32 %v744_v30, %v428_v33 }
 0xc01   :  { %v433_v37 = vsel %vm432_vm8, %v744_v30, %v429_v34 }
 0xc02   :  { %v438_v40 = vsel %vm435_vm9, %v437_v38, %v433_v37 }
 0xc03   :  { %v441_v42 = vmul.f32 %v438_v40, %v390_v16 }
 0xc60   :  { %v444_v39 = vpop.permute.xlu0 %443 }
 0xc61   :  { %v446_v41 = vmul.f32 %v444_v39, %v438_v40 }
 0xc63   :  { %448 = vrot.lane.b32.xlu1 %v446_v41, %s871_s0  ;;  %v687_v41 = vld [vmem:[#allocation9] sm:$0xff] }
 0xcd5   :  { %v449_v43 = vpop.permute.xlu1 %448 }
 0xcd6   :  { %v451_v44 = vadd.f32 %v449_v43, %v441_v42 }
 0xcd8   :  { %745 = vtanh.f32 %v451_v44 }
 0xcde   :  { %v746_v45 = vpop.eup %745 }
 0xcdf   :  { %454 = vrot.lane.b32.xlu2 %v746_v45, %s866_s23 }
 0xd39   :  { %v455_v46 = vpop.permute.xlu2 %454 }
 0xd3a   :  { %v457_v47 = vmul.f32 %v455_v46, %v438_v40  ;;  %v688_v40 = vld [vmem:[#allocation9 + $0x8] sm:$0xff] }
 0xd3b   :  { %626 = vmatpush.bf16.msra.mxu0 %v688_v40 }
 0xd3c   :  { %v458_v48 = vpack.c.bf16 %v457_v47, %v457_v47  ;;  %v698_v47 = vld [vmem:[%s969_s3] ss:$0 sm:$0xff] }
 0xd3e   :  { %463 = vrot.lane.b32.xlu0 %v458_v48, %s871_s0 }
 0xd3f   :  { %627 = vmatpush.bf16.msra.mxu0 %v687_v41 }
 0xdb0   :  { %v464_v49 = vpop.permute.xlu0 %463 }
 0xdb1   :  { %672 = vmatmul.msk.bf16.vlgmr.msrb.gmra.mxu2 %vm70_vm0, %v464_v49 }
 0xe34   :  { %v477_v52 = vpop.f32.mrf.mxu2 }
 0xe35   :  { %v481_v53 = vadd.f32 %v477_v52, %v461_v51 }
 0xe37   :  { %747 = vtanh.f32 %v481_v53  ;;  %v673_v56 = vmul.f32 -1.442695, %v481_v53 }
 0xe39   :  { %749 = vpow2.f32 %v673_v56 }
 0xe3c   :  { %v479_v54 = vpop.f32.mrf.mxu2 }
 0xe3d   :  { %v748_v55 = vpop.eup %747 }
 0xe3e   :  { %504 = vrot.lane.b32.xlu1 %v748_v55, %s866_s23 }
 0xe3f   :  { %v750_v57 = vpop.eup %749 }
 0xe40   :  { %v485_v58 = vadd.f32 1.0, %v750_v57 }
 0xe42   :  { %751 = vrcp.f32 %v485_v58  ;;  %v497_v0 = vand.u32 2147483648, %v485_v58  ;;  %vm491_vm11 = vweird.f32 %v485_v58  ;;  %v495_v1 = vand.u32 2147483647, %v485_v58 }
 0xe44   :  { %v498_v3 = vor.u32 1.1754944e-38, %v497_v0  ;;  %vm496_vm13 = vcmp.eq.f32.partialorder %v495_v1, 8.507059e+37 }
 0xe48   :  { %v752_v59 = vpop.eup %751 }
 0xe49   :  { %v487_v60 = vmul.f32 %v752_v59, %v485_v58  ;;  %vm492_vm10 = vweird.f32 %v752_v59 }
 0xe4a   :  { %vm493_vm12 = vmor %vm491_vm11, %vm492_vm10 }
 0xe4b   :  { %v488_v61 = vsub.f32 1.0, %v487_v60 }
 0xe4d   :  { %v489_v62 = vmul.f32 %v752_v59, %v488_v61 }
 0xe4f   :  { %v490_v63 = vadd.f32 %v752_v59, %v489_v62 }
 0xe51   :  { %v494_v2 = vsel %vm493_vm12, %v752_v59, %v490_v63 }
 0xe52   :  { %v499_v5 = vsel %vm496_vm13, %v498_v3, %v494_v2 }
 0xe53   :  { %v502_v7 = vmul.f32 %v499_v5, %v451_v44 }
 0xeb0   :  { %v505_v4 = vpop.permute.xlu1 %504 }
 0xeb1   :  { %v507_v6 = vmul.f32 %v505_v4, %v499_v5 }
 0xeb3   :  { %509 = vrot.lane.b32.xlu2 %v507_v6, %s871_s0 }
 0xf0d   :  { %v510_v8 = vpop.permute.xlu2 %509 }
 0xf0e   :  { %v512_v9 = vadd.f32 %v510_v8, %v502_v7 }
 0xf10   :  { %753 = vtanh.f32 %v512_v9 }
 0xf16   :  { %v754_v10 = vpop.eup %753 }
 0xf17   :  { %515 = vrot.lane.b32.xlu0 %v754_v10, %s866_s23 }
 0xf89   :  { %v516_v11 = vpop.permute.xlu0 %515 }
 0xf8a   :  { %v518_v12 = vmul.f32 %v516_v11, %v499_v5 }
 0xf8c   :  { %v519_v13 = vpack.c.bf16 %v518_v12, %v518_v12 }
 0xf8e   :  { %524 = vrot.lane.b32.xlu1 %v519_v13, %s871_s0 }
0x1000   :  { %v525_v14 = vpop.permute.xlu1 %524 }
0x1001   :  { %674 = vmatmul.msk.bf16.vlgmr.msrb.gmra.mxu3 %vm70_vm0, %v525_v14 }
0x1084   :  { %v538_v16 = vpop.f32.mrf.mxu3 }
0x1085   :  { %v542_v17 = vadd.f32 %v538_v16, %v522_v15 }
0x1087   :  { %755 = vtanh.f32 %v542_v17  ;;  %v675_v20 = vmul.f32 -1.442695, %v542_v17 }
0x1089   :  { %757 = vpow2.f32 %v675_v20 }
0x108c   :  { %v540_v18 = vpop.f32.mrf.mxu3 }
0x108d   :  { %v756_v19 = vpop.eup %755 }
0x108e   :  { %565 = vrot.lane.b32.xlu2 %v756_v19, %s866_s23 }
0x108f   :  { %v758_v21 = vpop.eup %757 }
0x1090   :  { %v546_v22 = vadd.f32 1.0, %v758_v21 }
0x1092   :  { %759 = vrcp.f32 %v546_v22  ;;  %v558_v28 = vand.u32 2147483648, %v546_v22  ;;  %vm552_vm15 = vweird.f32 %v546_v22  ;;  %v556_v29 = vand.u32 2147483647, %v546_v22 }
0x1094   :  { %v559_v31 = vor.u32 1.1754944e-38, %v558_v28  ;;  %vm557_vm2 = vcmp.eq.f32.partialorder %v556_v29, 8.507059e+37 }
0x1098   :  { %v760_v23 = vpop.eup %759 }
0x1099   :  { %v548_v24 = vmul.f32 %v760_v23, %v546_v22  ;;  %vm553_vm14 = vweird.f32 %v760_v23 }
0x109a   :  { %vm554_vm1 = vmor %vm552_vm15, %vm553_vm14 }
0x109b   :  { %v549_v25 = vsub.f32 1.0, %v548_v24 }
0x109d   :  { %v550_v26 = vmul.f32 %v760_v23, %v549_v25 }
0x109f   :  { %v551_v27 = vadd.f32 %v760_v23, %v550_v26 }
0x10a1   :  { %v555_v30 = vsel %vm554_vm1, %v760_v23, %v551_v27 }
0x10a2   :  { %v560_v33 = vsel %vm557_vm2, %v559_v31, %v555_v30 }
0x10a3   :  { %v563_v35 = vmul.f32 %v560_v33, %v512_v9 }
0x10e8   :  { %v566_v32 = vpop.permute.xlu2 %565 }
0x10e9   :  { %v568_v34 = vmul.f32 %v566_v32, %v560_v33 }
0x10eb   :  { %570 = vrot.lane.b32.xlu0 %v568_v34, %s871_s0 }
0x115d   :  { %v571_v36 = vpop.permute.xlu0 %570 }
0x115e   :  { %v573_v37 = vadd.f32 %v571_v36, %v563_v35 }
0x1160   :  { %761 = vtanh.f32 %v573_v37  ;;  %v593_v38 = vpack.c.bf16 %v573_v37, %v573_v37 }
0x1162   :  { %603 = vrot.lane.b32.xlu1 %v593_v38, %s872_s2 }
0x1166   :  { %v762_v39 = vpop.eup %761 }
0x1167   :  { %576 = vrot.lane.b32.xlu2 %v762_v39, %s866_s23 }
0x116a   :  { %586 = vrot.lane.b32.xlu1 %v573_v37, %s872_s2 }
0x11c1   :  { %v577_v42 = vpop.permute.xlu2 %576 }
0x11c2   :  { %v579_v43 = vmul.f32 %v577_v42, %v560_v33 }
0x11c4   :  { %581 = vrot.lane.b32.xlu0 %v579_v43, %s871_s0 }
0x11d4   :  { %v604_v44 = vpop.permute.xlu1 %603 }
0x11d5   :  { %684 = vmatmul.msk.bf16.vlgmr.msra.gmra.mxu0 %vm70_vm0, %v604_v44 }
0x11dc   :  { %v587_v45 = vpop.permute.xlu1 %586 }
0x11dd   :  { %589 = vst.msk [vmem:[#allocation3] sm:$0xff] %vm70_vm0, %v587_v45 }
0x1236   :  { %v582_v46 = vpop.permute.xlu0 %581 }
0x1237   :  { %584 = vst.msk [vmem:[#allocation2] sm:$0xff] %vm70_vm0, %v582_v46 }
0x1252   :  { %v629_v48 = vpop.f32.mrf.mxu0 }
0x1253   :  { %v630_v49 = vadd.f32 %v698_v47, %v629_v48 }
0x1255   :  { %633 = vst [vmem:[#allocation10] sm:$0xff] %v630_v49 }
0x1256   :  { %644 = dma.vmem_to_hbm [thread:$0]  %s640_s8, 128, %s642_s11, [#allocation6]  }
0x125a   :  { %v631_v50 = vpop.f32.mrf.mxu0 }
0x125b   :  { %863 = dma.done.wait [#allocation6], 128  }
0x125c   :  { %864 = vsyncadd [#allocation6], 4294967168 }
0x125d   :  { %649 = vsyncpa [#allocation5], 1 }
0x125e   :  { %650 = vsyncpa [#allocation8], 1 }
0x125f   :  { %651 = vsyncpa [#allocation6], 1 }

</bundles_post_ra>
